<compile_context>
chip_gen: v7x
topology: tpu7x:2x2x1
jax: 0.10.0
libtpu: 0.0.40
codegen_flags: <defaults>
</compile_context>

<pallas_src>
import functools

import jax
import jax.numpy as jnp
from jax.experimental import pallas as pl
from jax.experimental.pallas import tpu as pltpu


def _smooth_kernel(packed_ref, mask_ref, out_ref, *, width, n_disp, n_img):
    """One batch element: packed (disp ++ frame) slab -> fused scalar partials."""
    x = packed_ref[0].astype(jnp.float32)          # (Cd + C, HW)
    m = mask_ref[...]                              # (2, HW), {0,1} f32
    mx = m[0:1, :]                                 # valid horizontal pairs
    my = m[1:2, :]                                 # valid vertical pairs

    hw = x.shape[1]

    # One XLU roll per direction shared by disparity AND image channels.
    # pltpu.roll(x, +s) pairs flat position i with position i - s, so the
    # wrapped / row-crossing pairs are exactly col==0 (horizontal) and
    # row==0 (vertical); those are zeroed by the precomputed masks.
    adx = jnp.abs(x - pltpu.roll(x, shift=1, axis=1))        # (Cd+C, HW)
    ady = jnp.abs(x - pltpu.roll(x, shift=width, axis=1))

    gdx = adx[0:n_disp, :]                          # (Cd, HW) disparity gradients
    gdy = ady[0:n_disp, :]

    # Image gradient = channel mean over the frame rows: total sublane sum
    # minus the disparity rows, with the 1/C scale folded into the exp arg.
    gix = (jnp.sum(adx, axis=0, keepdims=True)
           - jnp.sum(gdx, axis=0, keepdims=True)) * (1.0 / n_img)   # (1, HW)
    giy = (jnp.sum(ady, axis=0, keepdims=True)
           - jnp.sum(gdy, axis=0, keepdims=True)) * (1.0 / n_img)

    # Validity mask folded into the edge weight (no vselects).
    wx = jnp.exp(-gix) * mx
    wy = jnp.exp(-giy) * my

    # Raw per-channel sums; the 1/(mean+eps) normalisation of the reference
    # factors out of |.| and is applied with one exact scalar divide.
    sx_c = jnp.sum(gdx * wx, axis=1, keepdims=True)           # (Cd, 1)
    sy_c = jnp.sum(gdy * wy, axis=1, keepdims=True)
    sum_d = jnp.sum(x[0:n_disp, :], axis=1, keepdims=True)    # (Cd, 1)
    inv_mean = jnp.abs(1.0 / (sum_d * (1.0 / hw) + 1e-7))

    sx = jnp.sum(sx_c * inv_mean)                              # scalar
    sy = jnp.sum(sy_c * inv_mean)

    # Fused lane-dense output block: sx in lane 0, sy in lane 1.
    lane = jax.lax.broadcasted_iota(jnp.int32, (1, 1, 128), 2)
    out_ref[...] = jnp.where(lane == 0, sx, 0.0) + jnp.where(lane == 1, sy, 0.0)


def smoothness_loss_pallas(target_frame, pred_disp, lambda_smooth=0.001):
    B, C, H, W = target_frame.shape
    Bd, Cd, Hd, Wd = pred_disp.shape
    assert B == Bd and (H, W) == (Hd, Wd)
    assert H >= 2 and W >= 2  # need at least one vertical / horizontal pair

    HW = H * W
    NC = Cd + C

    # Pack disparity + frame into one lane-dense slab: single input DMA per
    # step, one roll per direction covering all channels.
    packed = jnp.concatenate(
        [pred_disp.reshape(B, Cd, HW).astype(jnp.float32),
         target_frame.reshape(B, C, HW).astype(jnp.float32)], axis=1)

    # Resident {0,1} validity masks (replace 4 in-kernel coordinate rolls).
    flat = jnp.arange(HW, dtype=jnp.int32)
    mask_x = (flat % W != 0).astype(jnp.float32)   # pair (h,w)-(h,w-1) exists
    mask_y = (flat >= W).astype(jnp.float32)       # pair (h,w)-(h-1,w) exists
    masks = jnp.stack([mask_x, mask_y], axis=0)    # (2, HW)

    kernel = functools.partial(_smooth_kernel, width=W, n_disp=Cd, n_img=C)

    block_bytes = NC * HW * 4
    vmem_limit = int(min(32 * 1024 * 1024, max(4 * 1024 * 1024, 16 * block_bytes)))

    # TODO(synk): for production W >= 128, switch to the native (H, W) layout
    # (H->sublanes, W->lanes) and tile over H with raw per-tile partial sums so
    # large frames fit v7x's 64 MiB / v5e's 16 MiB scoped VMEM; and for many
    # tiny frames, block several batch elements per grid step to amortise the
    # ~0.35 us per-step pipeline overhead.
    out = pl.pallas_call(
        kernel,
        out_shape=jax.ShapeDtypeStruct((B, 1, 128), jnp.float32),
        grid_spec=pltpu.PrefetchScalarGridSpec(
            num_scalar_prefetch=0,
            grid=(B,),
            in_specs=[
                pl.BlockSpec((1, NC, HW), lambda b: (b, 0, 0)),   # packed slab
                pl.BlockSpec((2, HW), lambda b: (0, 0)),          # resident masks
            ],
            out_specs=pl.BlockSpec((1, 1, 128), lambda b: (b, 0, 0)),
        ),
        compiler_params=pltpu.CompilerParams(
            dimension_semantics=("parallel",),
            vmem_limit_bytes=vmem_limit),
    )(packed, masks)

    # Tiny final reduction + lambda scaling in the wrapper.
    count_x = B * Cd * H * (W - 1)
    count_y = B * Cd * (H - 1) * W
    loss = jnp.float32(lambda_smooth) * (
        jnp.sum(out[:, 0, 0]) / count_x + jnp.sum(out[:, 0, 1]) / count_y)
    return {"smooth": loss}


def smoothness_loss_ref(disp, frame, lambda_smooth=0.001):
    """Pure-JAX reference matching the PyTorch semantics exactly."""
    mean_disp = jnp.mean(disp, axis=(2, 3), keepdims=True)
    norm_disp = disp / (mean_disp + 1e-07)
    gdx = jnp.abs(norm_disp[:, :, :, :-1] - norm_disp[:, :, :, 1:])
    gdy = jnp.abs(norm_disp[:, :, :-1, :] - norm_disp[:, :, 1:, :])
    gix = jnp.mean(jnp.abs(frame[:, :, :, :-1] - frame[:, :, :, 1:]),
                   axis=1, keepdims=True)
    giy = jnp.mean(jnp.abs(frame[:, :, :-1, :] - frame[:, :, 1:, :]),
                   axis=1, keepdims=True)
    gdx = gdx * jnp.exp(-gix)
    gdy = gdy * jnp.exp(-giy)
    return lambda_smooth * (jnp.mean(gdx) + jnp.mean(gdy))


if __name__ == "__main__":
    key = jax.random.PRNGKey(0)
    k_frame, k_disp = jax.random.split(key)

    B, C, Cd, H, W = 2, 4, 1, 16, 16
    target_frame = jax.random.uniform(k_frame, (B, C, H, W), dtype=jnp.float32)
    pred_disp = jax.random.uniform(k_disp, (B, Cd, H, W), dtype=jnp.float32,
                                   minval=0.1, maxval=1.0)

    loss = smoothness_loss_pallas(target_frame, pred_disp, lambda_smooth=0.001)
    smooth = jax.block_until_ready(loss["smooth"])

    ref = jax.block_until_ready(
        smoothness_loss_ref(pred_disp, target_frame, lambda_smooth=0.001))

    assert jnp.allclose(smooth, ref, rtol=1e-4, atol=1e-7), (smooth, ref)
    print("KERNEL_OK")
</pallas_src>

<mosaic_0001>
module attributes {stable_mosaic.version = 11 : i64} {
  func.func @_smooth_kernel(%arg0: i32, %arg1: memref<1x5x256xf32, #tpu.memory_space<vmem>>, %arg2: memref<2x256xf32, #tpu.memory_space<vmem>>, %arg3: memref<1x1x128xf32, #tpu.memory_space<vmem>>) attributes {dimension_semantics = [#tpu.dimension_semantics<parallel>], iteration_bounds = array<i64: 2>, scalar_prefetch = 0 : i64, scratch_operands = 0 : i64, tpu.core_type = #tpu.core_type<tc>, window_params = [{transform_indices = @transform_0, window_bounds = array<i64: 1, 5, 256>}, {pipeline_mode = #tpu.pipeline_mode<synchronous>, transform_indices = @transform_1, window_bounds = array<i64: 2, 256>}, {transform_indices = @transform_2, window_bounds = array<i64: 1, 1, 128>}]} {
    %c0 = arith.constant 0 : index
    %c0_0 = arith.constant 0 : index
    %c0_1 = arith.constant 0 : index
    %0 = vector.load %arg1[%c0, %c0_0, %c0_1] : memref<1x5x256xf32, #tpu.memory_space<vmem>>, vector<1x5x256xf32>
    %1 = vector.shape_cast %0 : vector<1x5x256xf32> to vector<5x256xf32>
    %c0_2 = arith.constant 0 : index
    %c0_3 = arith.constant 0 : index
    %2 = vector.load %arg2[%c0_2, %c0_3] : memref<2x256xf32, #tpu.memory_space<vmem>>, vector<2x256xf32>
    %3 = vector.extract_strided_slice %2 {offsets = [0, 0], sizes = [1, 256], strides = [1, 1]} : vector<2x256xf32> to vector<1x256xf32>
    %4 = vector.extract_strided_slice %2 {offsets = [1, 0], sizes = [1, 256], strides = [1, 1]} : vector<2x256xf32> to vector<1x256xf32>
    %c1_i32 = arith.constant 1 : i32
    %5 = tpu.dynamic_rotate %1 by %c1_i32 dim 1 : vector<5x256xf32>, i32 -> vector<5x256xf32>
    %6 = arith.subf %1, %5 : vector<5x256xf32>
    %7 = math.absf %6 : vector<5x256xf32>
    %c16_i32 = arith.constant 16 : i32
    %8 = tpu.dynamic_rotate %1 by %c16_i32 dim 1 : vector<5x256xf32>, i32 -> vector<5x256xf32>
    %9 = arith.subf %1, %8 : vector<5x256xf32>
    %10 = math.absf %9 : vector<5x256xf32>
    %11 = vector.extract_strided_slice %7 {offsets = [0, 0], sizes = [1, 256], strides = [1, 1]} : vector<5x256xf32> to vector<1x256xf32>
    %12 = vector.extract_strided_slice %10 {offsets = [0, 0], sizes = [1, 256], strides = [1, 1]} : vector<5x256xf32> to vector<1x256xf32>
    %cst = arith.constant dense<0.000000e+00> : vector<256xf32>
    %13 = vector.multi_reduction <add>, %7, %cst [0] : vector<5x256xf32> to vector<256xf32>
    %14 = vector.shape_cast %13 : vector<256xf32> to vector<1x256xf32>
    %cst_4 = arith.constant dense<0.000000e+00> : vector<256xf32>
    %15 = vector.multi_reduction <add>, %11, %cst_4 [0] : vector<1x256xf32> to vector<256xf32>
    %16 = vector.shape_cast %15 : vector<256xf32> to vector<1x256xf32>
    %17 = arith.subf %14, %16 : vector<1x256xf32>
    %cst_5 = arith.constant 2.500000e-01 : f32
    %18 = vector.broadcast %cst_5 : f32 to vector<1x256xf32>
    %19 = arith.mulf %17, %18 : vector<1x256xf32>
    %cst_6 = arith.constant dense<0.000000e+00> : vector<256xf32>
    %20 = vector.multi_reduction <add>, %10, %cst_6 [0] : vector<5x256xf32> to vector<256xf32>
    %21 = vector.shape_cast %20 : vector<256xf32> to vector<1x256xf32>
    %cst_7 = arith.constant dense<0.000000e+00> : vector<256xf32>
    %22 = vector.multi_reduction <add>, %12, %cst_7 [0] : vector<1x256xf32> to vector<256xf32>
    %23 = vector.shape_cast %22 : vector<256xf32> to vector<1x256xf32>
    %24 = arith.subf %21, %23 : vector<1x256xf32>
    %cst_8 = arith.constant 2.500000e-01 : f32
    %25 = vector.broadcast %cst_8 : f32 to vector<1x256xf32>
    %26 = arith.mulf %24, %25 : vector<1x256xf32>
    %cst_9 = arith.constant 0.000000e+00 : f32
    %27 = vector.broadcast %cst_9 : f32 to vector<1x256xf32>
    %28 = arith.subf %27, %19 : vector<1x256xf32>
    %29 = math.exp %28 : vector<1x256xf32>
    %30 = arith.mulf %29, %3 : vector<1x256xf32>
    %cst_10 = arith.constant 0.000000e+00 : f32
    %31 = vector.broadcast %cst_10 : f32 to vector<1x256xf32>
    %32 = arith.subf %31, %26 : vector<1x256xf32>
    %33 = math.exp %32 : vector<1x256xf32>
    %34 = arith.mulf %33, %4 : vector<1x256xf32>
    %35 = arith.mulf %11, %30 : vector<1x256xf32>
    %cst_11 = arith.constant dense<0.000000e+00> : vector<1xf32>
    %36 = vector.multi_reduction <add>, %35, %cst_11 [1] : vector<1x256xf32> to vector<1xf32>
    %37 = vector.shape_cast %36 : vector<1xf32> to vector<1x1xf32>
    %38 = arith.mulf %12, %34 : vector<1x256xf32>
    %cst_12 = arith.constant dense<0.000000e+00> : vector<1xf32>
    %39 = vector.multi_reduction <add>, %38, %cst_12 [1] : vector<1x256xf32> to vector<1xf32>
    %40 = vector.shape_cast %39 : vector<1xf32> to vector<1x1xf32>
    %41 = vector.extract_strided_slice %1 {offsets = [0, 0], sizes = [1, 256], strides = [1, 1]} : vector<5x256xf32> to vector<1x256xf32>
    %cst_13 = arith.constant dense<0.000000e+00> : vector<1xf32>
    %42 = vector.multi_reduction <add>, %41, %cst_13 [1] : vector<1x256xf32> to vector<1xf32>
    %43 = vector.shape_cast %42 : vector<1xf32> to vector<1x1xf32>
    %cst_14 = arith.constant 3.906250e-03 : f32
    %44 = vector.broadcast %cst_14 : f32 to vector<1x1xf32>
    %45 = arith.mulf %43, %44 : vector<1x1xf32>
    %cst_15 = arith.constant 1.000000e-07 : f32
    %46 = vector.broadcast %cst_15 : f32 to vector<1x1xf32>
    %47 = arith.addf %45, %46 : vector<1x1xf32>
    %cst_16 = arith.constant 1.000000e+00 : f32
    %48 = vector.broadcast %cst_16 : f32 to vector<1x1xf32>
    %49 = arith.divf %48, %47 : vector<1x1xf32>
    %50 = math.absf %49 : vector<1x1xf32>
    %51 = arith.mulf %37, %50 : vector<1x1xf32>
    %52 = vector.shape_cast %51 : vector<1x1xf32> to vector<1x1x1xf32>
    %cst_17 = arith.constant dense<0.000000e+00> : vector<1xf32>
    %53 = vector.multi_reduction <add>, %52, %cst_17 [1, 2] : vector<1x1x1xf32> to vector<1xf32>
    %54 = vector.shape_cast %53 : vector<1xf32> to vector<1x1x1xf32>
    %55 = vector.extract %54[0, 0, 0] : f32 from vector<1x1x1xf32>
    %56 = arith.mulf %40, %50 : vector<1x1xf32>
    %57 = vector.shape_cast %56 : vector<1x1xf32> to vector<1x1x1xf32>
    %cst_18 = arith.constant dense<0.000000e+00> : vector<1xf32>
    %58 = vector.multi_reduction <add>, %57, %cst_18 [1, 2] : vector<1x1x1xf32> to vector<1xf32>
    %59 = vector.shape_cast %58 : vector<1xf32> to vector<1x1x1xf32>
    %60 = vector.extract %59[0, 0, 0] : f32 from vector<1x1x1xf32>
    %61 = tpu.iota {dimensions = array<i32: 2>} : vector<1x1x128xi32>
    %c0_i32 = arith.constant 0 : i32
    %62 = vector.broadcast %c0_i32 : i32 to vector<1x1x128xi32>
    %63 = arith.cmpi eq, %61, %62 : vector<1x1x128xi32>
    %cst_19 = arith.constant 0.000000e+00 : f32
    %64 = vector.broadcast %55 : f32 to vector<1x1x128xf32>
    %65 = vector.broadcast %cst_19 : f32 to vector<1x1x128xf32>
    %66 = arith.select %63, %64, %65 : vector<1x1x128xi1>, vector<1x1x128xf32>
    %c1_i32_20 = arith.constant 1 : i32
    %67 = vector.broadcast %c1_i32_20 : i32 to vector<1x1x128xi32>
    %68 = arith.cmpi eq, %61, %67 : vector<1x1x128xi32>
    %cst_21 = arith.constant 0.000000e+00 : f32
    %69 = vector.broadcast %60 : f32 to vector<1x1x128xf32>
    %70 = vector.broadcast %cst_21 : f32 to vector<1x1x128xf32>
    %71 = arith.select %68, %69, %70 : vector<1x1x128xi1>, vector<1x1x128xf32>
    %72 = arith.addf %66, %71 : vector<1x1x128xf32>
    %c0_22 = arith.constant 0 : index
    %c0_23 = arith.constant 0 : index
    %c0_24 = arith.constant 0 : index
    %73 = vector.load %arg3[%c0_22, %c0_23, %c0_24] : memref<1x1x128xf32, #tpu.memory_space<vmem>>, vector<1x1x128xf32>
    tpu.vector_store %arg3[%c0_22, %c0_23, %c0_24], %72 {strides = array<i32>} : memref<1x1x128xf32, #tpu.memory_space<vmem>>, vector<1x1x128xf32>,
    return
  }
  func.func @transform_0(%arg0: i32) -> (i32, i32, i32) {
    %c0_i32 = arith.constant 0 : i32
    %c0_i32_0 = arith.constant 0 : i32
    %c0_i32_1 = arith.constant 0 : i32
    return %arg0, %c0_i32, %c0_i32_0 : i32, i32, i32
  }
  func.func @transform_1(%arg0: i32) -> (i32, i32) {
    %c0_i32 = arith.constant 0 : i32
    %c0_i32_0 = arith.constant 0 : i32
    %c0_i32_1 = arith.constant 0 : i32
    return %c0_i32, %c0_i32_0 : i32, i32
  }
  func.func @transform_2(%arg0: i32) -> (i32, i32, i32) {
    %c0_i32 = arith.constant 0 : i32
    %c0_i32_0 = arith.constant 0 : i32
    %c0_i32_1 = arith.constant 0 : i32
    return %arg0, %c0_i32, %c0_i32_0 : i32, i32, i32
  }
}

</mosaic_0001>

<bundles_post_ra>
// kernel: tpu_custom_call.1
= control target key start
LH: loop header
LB: loop body
LE: loop exit
PB: predicated region body
PF: predicated region fallthrough
CT: control target
= control target key end

     0   :  { %7 = vsyncpa [#allocation3], 0  ;;  %s637_s0 = inlined_call_operand.vmem [shape: f32[2,5,256], index: 0, kind: input, shape index: {}]   ;;  %s638_s1 = inlined_call_operand.vmem [shape: f32[2,256], index: 1, kind: input, shape index: {}]   ;;  %s639_s2 = inlined_call_operand.hbm [shape: f32[2,1,128], index: 2, kind: output, shape index: {}]  }
   0x1   :  { %9 = vsyncpa [#allocation3 + $0x1], 0  ;;  %s500_s9 = smov 0   ;;  %s502_s10 = smov 0  }
   0x2   :  { %s504_s11 = smov 0   ;;  %s506_s12 = smov 0  }
   0x3 LB: > { %s521_s13 = sadd.s32 4294967295, %s480_s12   ;;  %s353_s14 = sadd.s32 4294967294, %s480_s12   ;;  %s480_s12 = sphi %s506_s12, %s645_s12   ;;  %s476_s11 = sphi %s504_s11, %s644_s11   ;;  %s472_s10 = sphi %s502_s10, %s643_s10   ;;  %s468_s9 = sphi %s500_s9, %s642_s9  }
   0x4   : > { %s525_s15 = sadd.s32 1, %s480_s12   ;;  %s69_s16 = sadd.s32 1, %s476_s11 }
   0x5   : > { %s66_s17 = ssub.s32 %s480_s12, %s525_s15  ;;  %p79_p0 = scmp.ne.s32.totalorder %s476_s11, %s472_s10 }
   0x6   : > { %p67_p1 = scmp.eq.s32.totalorder %s66_s17, 0  ;;  %p80_p2 = scmp.eq.s32.totalorder %s521_s13, 1 }
   0x7   : > { %p85_p3 = scmp.ne.s32.totalorder %s472_s10, %s468_s9  ;;  %p86_p4 = scmp.eq.s32.totalorder %s353_s14, 1 }
   0x8   : > { %s536_s18 = scalar_select %p67_p1, %s476_s11, %s69_s16  }
   0x9   : > { %p538_p5 = por %p80_p2, %p79_p0  ;;  %p542_p6 = por %p86_p4, %p85_p3 }
   0xa   : > { %p356_p7 = scmp.ge.s32.totalorder %s480_s12, 1  ;;  %p115_p8 = scmp.lt.s32.totalorder %s480_s12, 3 }
   0xc   : > { %p116_p9 = pnand %p356_p7, %p115_p8 }
   0xd   : > { %p136_p10 = scmp.lt.s32.totalorder (!%p116_p9), %s521_s13, 1  ;;  %s482_s26 = smov (!%p116_p9), 16   ;;  %vm248_vm0 = vcmask (!%p116_p9), 1040384   ;;  %v148_v5 = vlaneseq (!%p116_p9)  ;;  %vm168_vm3 = vcmask (!%p116_p9), 1044480  }
   0xe   : > { %119 = sbr.rel (%p116_p9) target bundleno = 405 (0x195), region = 28  ;;  %s483_s27 = smov (!%p116_p9), 1  }
   0xf   : > { %v556_v6 = vand.u32 (!%p116_p9), 127, %v148_v5  ;;  %s134_s30 = sand.u32 (!%p116_p9), 1, %s472_s10   ;;  %s359_s4 = sshll.u32 (!%p116_p9), %s521_s13, 4 }
  0x10   : > { %s135_s6 = scalar_lea.vmem (!%p116_p9), [#allocation2], %s134_s30  ;;  %s595_s16 = scalar_lea.hbm (!%p116_p9), %s639_s2, %s359_s4 }
  0x11   : > { %vm161_vm1 = vcmp.lt.s32.totalorder (!%p116_p9), %v556_v6, 16  ;;  %vm150_vm2 = vcmp.lt.s32.totalorder (!%p116_p9), %v556_v6, 1  ;;  %vm277_vm4 = vcmp.eq.s32.totalorder (!%p116_p9), %v556_v6, 0  ;;  %vm280_vm5 = vcmp.eq.s32.totalorder (!%p116_p9), %v556_v6, 1  ;;  %s298_s7 = sshll.u32 (!%p116_p9), %s135_s6, 4  ;;  %s597_s7 = int_to_ptr.vmem [resolvable:$true] %s298_s7 }
  0x12   : > { %s418_s17 = scalar_lea.vmem (!%p116_p9), %s597_s7, 16 }
  0x13   : > { %p419_p11 = scmp.ne.s32.totalorder (!%p116_p9), %s597_s7, %s418_s17 }
  0x15   : > { %s137_s21 = scalar_select %p136_p10, %s521_s13, 1 }
  0x16   : > { %s286_s13 = scalar_lea.sflag [#allocation3], %s134_s30  ;;  %p420_p12 = pnand %p419_p11, %p538_p5 }
  0x17   : > { %s362_s22 = sshll.u32 %s137_s21, 4  ;;  %s484_s21 = smov [#allocation2]  }
  0x18   : > { %s140_s25 = scalar_lea.vmem %s637_s0, %s362_s22  ;;  %p421_p13 = pneg %p420_p12 }
  0x19   : > { %v141_v0 = vld [vmem:[%s140_s25] sm:$0x1f]  ;;  %v142_v1 = vld [vmem:[%s140_s25 + $0x8] sm:$0x1f]  ;;  %s422_s22 = sshll.u32 %s484_s21, 4  ;;  %s423_s22 = int_to_ptr.vmem [resolvable:$false] %s422_s22 }
  0x1a   : > { %157 = vrot.lane.b32.xlu1 %v141_v0, %s482_s26  ;;  %144 = vrot.lane.b32.xlu0 %v141_v0, %s483_s27  ;;  %v261_v2 = vsel %vm248_vm0, %v141_v0, 0.0  ;;  %v262_v3 = vsel %vm248_vm0, %v142_v1, 0.0  ;;  %s424_s23 = scalar_lea.vmem %s423_s22, 32  ;;  %p425_p0 = scmp.lt.s32.totalorder %s597_s7, %s423_s22 }
  0x1b   : > { %v263_v4 = vadd.f32 %v262_v3, %v261_v2  ;;  %v217_v2 = vshrl.u32 %v148_v5, 7  ;;  %p426_p1 = scmp.lt.s32.totalorder %s424_s23, %s418_s17 }
  0x1d   : > { %p427_p2 = por %p426_p1, %p425_p0 }
  0x1e   : > { %159 = vrot.lane.b32.xlu1 %v142_v1, %s482_s26  ;;  %146 = vrot.lane.b32.xlu0 %v142_v1, %s483_s27 }
  0x1f   : > { %p428_p3 = pnand %p427_p2, %p421_p13 }
  0x3d   : > { %264 = vadd.xlane.f32.xlu0 %v263_v4  ;;  %v236_v4 = vsub.s32 1, %v217_v2 }
  0x8c   : > { %v158_v7 = vpop.permute.xlu1 %157  ;;  %v145_v8 = vpop.permute.xlu0 %144 }
  0x90   : > { %v160_v9 = vpop.permute.xlu1 %159  ;;  %v147_v10 = vpop.permute.xlu0 %146 }
  0x91   : > { %v162_v11 = vsel %vm161_vm1, %v158_v7, %v160_v9  ;;  %v163_v12 = vsel %vm161_vm1, %v160_v9, %v158_v7  ;;  %v151_v13 = vsel %vm150_vm2, %v145_v8, %v147_v10  ;;  %v152_v14 = vsel %vm150_vm2, %v147_v10, %v145_v8  ;;  %v143_v7 = vld [vmem:[%s638_s1] sm:$0xf] }
  0x92   : > { %v164_v15 = vsub.f32 %v141_v0, %v163_v12  ;;  %v165_v16 = vsub.f32 %v142_v1, %v162_v11  ;;  %v153_v17 = vsub.f32 %v141_v0, %v152_v14  ;;  %v154_v18 = vsub.f32 %v142_v1, %v151_v13 }
  0x93   : > { %v240_v8 = vsub.s32 3, %v217_v2  ;;  %v218_v9 = vsub.s32 0, %v217_v2  ;;  %v222_v10 = vsub.s32 2, %v217_v2  ;;  %v237_v11 = vrot.slane %v143_v7, %v236_v4 }
  0x94   : > { %v560_v19 = vand.u32 2147483647, %v164_v15  ;;  %v562_v20 = vand.u32 2147483647, %v165_v16  ;;  %v564_v21 = vand.u32 2147483647, %v153_v17 }
  0x95   : > { %v566_v22 = vand.u32 2147483647, %v154_v18  ;;  %v241_v12 = vrot.slane %v143_v7, %v240_v8  ;;  %v219_v13 = vrot.slane %v143_v7, %v218_v9  ;;  %v223_v15 = vrot.slane %v143_v7, %v222_v10 }
  0x96   : > { %v189_v23 = vsel %vm168_vm3, %v560_v19, 0.0  ;;  %v196_v24 = vsel %vm168_vm3, %v562_v20, 0.0  ;;  %v169_v25 = vsel %vm168_vm3, %v564_v21, 0.0 }
  0x97   : > { %v190_v26 = vrot.slane %v189_v23, 4  ;;  %v197_v27 = vrot.slane %v196_v24, 4  ;;  %v170_v28 = vrot.slane %v169_v25, 4  ;;  %v176_v29 = vsel %vm168_vm3, %v566_v22, 0.0 }
  0x98   : > { %v177_v30 = vrot.slane %v176_v29, 4 }
  0x99   : > { %v191_v31 = vadd.f32 %v190_v26, %v189_v23  ;;  %v198_v32 = vadd.f32 %v197_v27, %v196_v24  ;;  %v171_v33 = vadd.f32 %v170_v28, %v169_v25 }
  0x9a   : > { %v178_v34 = vadd.f32 %v177_v30, %v176_v29 }
  0x9b   : > { %v192_v35 = vrot.slane %v191_v31, 2  ;;  %v199_v36 = vrot.slane %v198_v32, 2  ;;  %v172_v37 = vrot.slane %v171_v33, 2 }
  0x9c   : > { %v179_v38 = vrot.slane %v178_v34, 2 }
  0x9d   : > { %v193_v39 = vadd.f32 %v192_v35, %v191_v31  ;;  %v200_v40 = vadd.f32 %v199_v36, %v198_v32  ;;  %v173_v41 = vadd.f32 %v172_v37, %v171_v33 }
  0x9e   : > { %v180_v42 = vadd.f32 %v179_v38, %v178_v34 }
  0x9f   : > { %v194_v43 = vrot.slane %v193_v39, 1  ;;  %v201_v44 = vrot.slane %v200_v40, 1  ;;  %v174_v45 = vrot.slane %v173_v41, 1 }
  0xa0   : > { %v181_v46 = vrot.slane %v180_v42, 1 }
  0xa1   : > { %v195_v47 = vadd.f32 %v194_v43, %v193_v39  ;;  %v202_v48 = vadd.f32 %v201_v44, %v200_v40  ;;  %v175_v49 = vadd.f32 %v174_v45, %v173_v41 }
  0xa2   : > { %v182_v50 = vadd.f32 %v181_v46, %v180_v42 }
  0xa3   : > { %v205_v51 = vsub.f32 %v195_v47, %v560_v19  ;;  %v206_v52 = vsub.f32 %v202_v48, %v562_v20  ;;  %v185_v53 = vsub.f32 %v175_v49, %v564_v21 }
  0xa4   : > { %v186_v54 = vsub.f32 %v182_v50, %v566_v22 }
  0xa5   : > { %v207_v55 = vmul.f32 0.25, %v205_v51  ;;  %v208_v56 = vmul.f32 0.25, %v206_v52  ;;  %v187_v57 = vmul.f32 0.25, %v185_v53 }
  0xa6   : > { %v188_v58 = vmul.f32 0.25, %v186_v54 }
  0xa7   : > { %v228_v59 = vsub.f32 0.0, %v207_v55  ;;  %v229_v60 = vsub.f32 0.0, %v208_v56  ;;  %v209_v61 = vsub.f32 0.0, %v187_v57 }
  0xa8   : > { %v210_v62 = vsub.f32 0.0, %v188_v58 }
  0xa9   : > { %v230_v63 = vmul.f32 1.442695, %v228_v59  ;;  %v232_v0 = vmul.f32 1.442695, %v229_v60  ;;  %v211_v1 = vmul.f32 1.442695, %v209_v61 }
  0xaa   : > { %v213_v3 = vmul.f32 1.442695, %v210_v62 }
  0xab   : > { %408 = vpow2.f32 %v230_v63 }
  0xac   : > { %410 = vpow2.f32 %v232_v0 }
  0xad   : > { %412 = vpow2.f32 %v211_v1 }
  0xae   : > { %414 = vpow2.f32 %v213_v3 }
  0xb5   : > { %v409_v14 = vpop.eup %408 }
  0xb6   : > { %v411_v16 = vpop.eup %410  ;;  %v244_v5 = vmul.f32 %v409_v14, %v237_v11 }
  0xb7   : > { %v413_v17 = vpop.eup %412  ;;  %v245_v18 = vmul.f32 %v411_v16, %v241_v12 }
  0xb8   : > { %v415_v23 = vpop.eup %414  ;;  %v226_v24 = vmul.f32 %v413_v17, %v219_v13  ;;  %v254_v25 = vmul.f32 %v244_v5, %v560_v19 }
  0xb9   : > { %v227_v26 = vmul.f32 %v415_v23, %v223_v15  ;;  %v255_v27 = vmul.f32 %v245_v18, %v562_v20 }
  0xba   : > { %v246_v28 = vmul.f32 %v226_v24, %v564_v21  ;;  %v256_v29 = vsel %vm248_vm0, %v254_v25, 0.0 }
  0xbb   : > { %v247_v30 = vmul.f32 %v227_v26, %v566_v22  ;;  %v257_v31 = vsel %vm248_vm0, %v255_v27, 0.0 }
  0xbc   : > { %v249_v32 = vsel %vm248_vm0, %v246_v28, 0.0  ;;  %v258_v33 = vadd.f32 %v257_v31, %v256_v29 }
  0xbd   : > { %v250_v34 = vsel %vm248_vm0, %v247_v30, 0.0 }
  0xbe   : > { %v251_v35 = vadd.f32 %v250_v34, %v249_v32  ;;  %259 = vadd.xlane.f32.xlu0 %v258_v33 }
  0xc0   : > { %252 = vadd.xlane.f32.xlu1 %v251_v35 }
  0xca   : > { %v265_v19 = vpop.xlane.xlu0 %264 }
  0xcb   : > { %v266_v20 = vmul.f32 0.00390625, %v265_v19 }
  0xcd   : > { %v267_v36 = vadd.f32 1e-07, %v266_v20 }
  0xcf   : > { %416 = vrcp.f32 %v267_v36 }
  0xd9   : > { %v417_v21 = vpop.eup %416 }
  0xda   : > { %v270_v37 = vand.u32 2147483647, %v417_v21 }
 0x14b   : > { %v260_v38 = vpop.xlane.xlu0 %259 }
 0x14c   : > { %v274_v39 = vmul.f32 %v270_v37, %v260_v38 }
 0x14d   : > { %v253_v22 = vpop.xlane.xlu1 %252 }
 0x14e   : > { %v271_v40 = vmul.f32 %v270_v37, %v253_v22 }
 0x150   : > { %363 = vpush %v271_v40 }
 0x151   : > { %365 = vpush %v274_v39 }
 0x181   : > { %s364_s3 = spop %363 }
 0x182   : > { %v278_v41 = vstv %s364_s3  ;;  %s366_s5 = spop %365 }
 0x183   : > { %v279_v42 = vsel %vm277_vm4, %v278_v41, 0.0  ;;  %v281_v43 = vstv %s366_s5 }
 0x184   : > { %v282_v44 = vsel %vm280_vm5, %v281_v43, 0.0 }
 0x185   : > { %v283_v45 = vadd.f32 %v282_v44, %v279_v42 }
 0x187   : > { %284 = vst [vmem:[%s135_s6] sm:$0x1] %v283_v45 }
 0x188   : > { %431 = shalt.err (!%p428_p3)
}
 0x189   : > { %s432_s24 = scalar_lea.hbm %s595_s16, 16  ;;  %s436_s27 = scalar_lea.hbm %s639_s2, 32 }
 0x18a   : > { %p433_p4 = scmp.ne.s32.totalorder %s595_s16, %s432_s24  ;;  %p437_p9 = scmp.lt.u32.totalorder %s595_s16, %s639_s2 }
 0x18b   : > { %p438_p10 = scmp.lt.u32.totalorder %s436_s27, %s432_s24  ;;  %p440_p12 = scmp.lt.u32.totalorder %s432_s24, %s595_s16 }
 0x18c   : > { %p434_p7 = pnand %p433_p4, %p538_p5 }
 0x18d   : > { %p439_p11 = por %p438_p10, %p437_p9 }
 0x18e   : > { %p435_p8 = pneg %p434_p7 }
 0x18f   : > { %p441_p13 = por %p440_p12, %p439_p11 }
 0x191   : > { %p442_p0 = pnand %p441_p13, %p435_p8 }
 0x193   : > { %445 = shalt.err (!%p442_p0)
}
 0x194   : > { %367 = dma.vmem_to_hbm [thread:$0]  (%p538_p5), %s597_s7, 16, %s595_s16, %s286_s13  }
 0x195 PF: > { %p373_p1 = scmp.ge.s32.totalorder %s480_s12, 2  ;;  %s310_s30 = sand.u32 1, %s468_s9  }
 0x196   : > { %s311_s3 = scalar_lea.sflag [#allocation3], %s310_s30 }
 0x197   : > { %p370_p2 = pnand %p373_p1, %p542_p6 }
 0x199   : > { %463 = dma.done.wait (!%p370_p2), %s311_s3, 16  }
 0x19a   : > { %465 = vsyncadd (!%p370_p2), %s311_s3, 4294967280  ;;  %p12_p3 = scmp.ge.s32.totalorder %s525_s15, 4   ;;  %s642_s9 = smov %s472_s10 }
 0x19b   : > { %s643_s10 = smov %s476_s11  ;;  %s644_s11 = smov %s536_s18 }
 0x19c   : > { %s645_s12 = smov %s525_s15  ;;  %14 = sbr.rel (!%p12_p3) target bundleno = 3 (0x3), region = 63 }
 0x1a3   :  { %315 = vsyncpa [#allocation3], 1 }
 0x1a4   :  { %317 = vsyncpa [#allocation3 + $0x1], 1 }

</bundles_post_ra>
